<compile_context>
chip_gen: v7x
topology: tpu7x:2x2x1
jax: 0.10.0
libtpu: 0.0.40
codegen_flags: <defaults>
</compile_context>

<pallas_src>
import jax
import jax.numpy as jnp
from jax.experimental import pallas as pl
from jax.experimental.pallas import tpu as pltpu


_MIN_PALLAS_ROWS = 256  # below this, plain XLA is faster than a kernel launch


def _round_up(v, m):
    return ((v + m - 1) // m) * m


def _net2_kernel(xt_ref, w1_ref, b1_ref, w2_ref, b2_ref, out_ref):
    # xt_ref: [22, block_n]  (features on sublanes, batch on lanes)
    xt = xt_ref[...]
    # Layer 1 on the MXU: [10, 22] @ [22, block_n] -> [10, block_n], f32 accumulate.
    h = jnp.dot(w1_ref[...], xt, preferred_element_type=jnp.float32) + b1_ref[...]
    h = jnp.maximum(h, 0.0)
    # Layer 2 on VPU + XLU: weighted sublane reduction -> [1, block_n] (lane-dense).
    y = jnp.sum(h * w2_ref[...], axis=0, keepdims=True) + b2_ref[...]
    out_ref[...] = y.astype(out_ref.dtype)


def net2_forward(x, x_xgboost, x_prev, x_sup, params, *, block_n=4096):
    """Reproduces Net2.forward. `x` and `x_xgboost` are accepted (and reshaped,
    matching the PyTorch code) but unused, exactly like the reference module."""
    del x
    _ = x_xgboost.reshape(-1, 1)      # x_xgboost.view([-1, 1]) — unused afterwards
    x_sup = x_sup.reshape(-1)         # x_sup.view([-1, 1]) (kept flat; re-laid below)
    n = x_sup.shape[0]

    w1, b1, w2, b2 = params["w1"], params["b1"], params["w2"], params["b2"]
    # w1: [10, 22]  b1: [10, 1]  w2: [10, 1]  b2: [1, 1]

    if n < _MIN_PALLAS_ROWS:
        # Tiny batch: Pallas launch + DMA setup overhead dwarfs the compute.
        xin = jnp.concatenate([x_sup[:, None], x_prev], axis=1)       # [n, 22]
        h = jnp.maximum(xin @ w1.T + b1.reshape(1, -1), 0.0)
        return h @ w2 + b2.reshape(1, 1)

    n_feat = 1 + x_prev.shape[1]                                       # 22
    n_hidden = w1.shape[0]                                             # 10

    # Tile size: multiple of 128 lanes, no bigger than the (padded) batch.
    block_n = max(128, (min(block_n, _round_up(n, 128)) // 128) * 128)
    n_pad = _round_up(n, block_n)
    grid = (n_pad // block_n,)

    # Build the transposed [22, N] input slab once in the wrapper (XLA fuses the
    # transpose + concat into one pass). Batch now lives on the lane axis.
    xt = jnp.concatenate([x_sup[None, :], x_prev.T], axis=0)           # [22, n]
    if n_pad != n:
        xt = jnp.pad(xt, ((0, 0), (0, n_pad - n)))

    cost = pl.CostEstimate(
        flops=int(n_pad) * (2 * n_feat * n_hidden + 3 * n_hidden),     # ~470 * N
        transcendentals=0,
        bytes_accessed=int(n_pad) * (n_feat + 1) * 4
        + 4 * int(w1.size + b1.size + w2.size + b2.size),              # ~92 * N
    )

    out_t = pl.pallas_call(
        _net2_kernel,
        out_shape=jax.ShapeDtypeStruct((1, n_pad), jnp.float32),
        grid=grid,
        in_specs=[
            pl.BlockSpec((n_feat, block_n), lambda i: (0, i)),   # activations tile
            pl.BlockSpec(w1.shape, lambda i: (0, 0)),            # weights stay resident
            pl.BlockSpec(b1.shape, lambda i: (0, 0)),
            pl.BlockSpec(w2.shape, lambda i: (0, 0)),
            pl.BlockSpec(b2.shape, lambda i: (0, 0)),
        ],
        out_specs=pl.BlockSpec((1, block_n), lambda i: (0, i)),  # lane-dense output
        compiler_params=pltpu.CompilerParams(
            dimension_semantics=("parallel",),
        ),
        cost_estimate=cost,
    )(xt, w1, b1, w2, b2)

    # [1, n_pad] -> [n, 1]; the slice/reshape is layout-free plumbing.
    return out_t[0, :n].reshape(n, 1)


def init_params(key):
    """Deterministic init of the layers2 parameters (the only ones used in
    forward). Shapes follow PyTorch nn.Linear(22,10) and nn.Linear(10,1):
    weights stored as [out_features, in_features] (PyTorch layout), biases as
    column vectors for the transposed compute layout.
    The unused `self.layers` MLP is intentionally not materialized."""
    k1, k2, k3, k4 = jax.random.split(key, 4)
    # PyTorch nn.Linear default init: U(-1/sqrt(fan_in), 1/sqrt(fan_in))
    lim1 = 1.0 / jnp.sqrt(22.0)
    lim2 = 1.0 / jnp.sqrt(10.0)
    params = {
        "w1": jax.random.uniform(k1, (10, 22), jnp.float32, -lim1, lim1),
        "b1": jax.random.uniform(k2, (10, 1), jnp.float32, -lim1, lim1),
        "w2": jax.random.uniform(k3, (10, 1), jnp.float32, -lim2, lim2),
        "b2": jax.random.uniform(k4, (1, 1), jnp.float32, -lim2, lim2),
    }
    return params


if __name__ == "__main__":
    key = jax.random.PRNGKey(0)
    kp, kx, kg, kprev, ksup = jax.random.split(key, 5)

    # Large enough to exercise the tiled Pallas path (block_n=512 -> 4 grid steps),
    # still small by TPU standards.
    N = 2048
    params = init_params(kp)

    # Input shapes implied by the module:
    #   x:         [N, 2582]  (2559 + 21 + 1 + 1) — unused in forward
    #   x_xgboost: [N]        — reshaped to [N,1], then unused
    #   x_prev:    [N, 21]
    #   x_sup:     [N]        — reshaped to [N,1]
    x = jax.random.normal(kx, (N, 2582), jnp.float32)
    x_xgboost = jax.random.normal(kg, (N,), jnp.float32)
    x_prev = jax.random.normal(kprev, (N, 21), jnp.float32)
    x_sup = jax.random.normal(ksup, (N,), jnp.float32)

    out = net2_forward(x, x_xgboost, x_prev, x_sup, params, block_n=512)
    out = jax.block_until_ready(out)

    # Pure-JAX reference check (f32 throughout, so tolerances stay tight).
    xin = jnp.concatenate([x_sup.reshape(-1, 1), x_prev], axis=1)
    h_ref = jnp.maximum(xin @ params["w1"].T + params["b1"].reshape(1, -1), 0.0)
    ref = h_ref @ params["w2"] + params["b2"].reshape(1, 1)

    assert out.shape == (N, 1)
    assert jnp.allclose(out, ref, atol=1e-5, rtol=1e-5)

    print("KERNEL_OK")
</pallas_src>

<mosaic_0001>
module attributes {stable_mosaic.version = 11 : i64} {
  func.func @_net2_kernel(%arg0: i32, %arg1: memref<22x512xf32, #tpu.memory_space<vmem>>, %arg2: memref<10x22xf32, #tpu.memory_space<vmem>>, %arg3: memref<10x1xf32, #tpu.memory_space<vmem>>, %arg4: memref<10x1xf32, #tpu.memory_space<vmem>>, %arg5: memref<1x1xf32, #tpu.memory_space<vmem>>, %arg6: memref<1x512xf32, #tpu.memory_space<vmem>>) attributes {dimension_semantics = [#tpu.dimension_semantics<parallel>], iteration_bounds = array<i64: 4>, scalar_prefetch = 0 : i64, scratch_operands = 0 : i64, tpu.core_type = #tpu.core_type<tc>, window_params = [{transform_indices = @transform_0, window_bounds = array<i64: 22, 512>}, {pipeline_mode = #tpu.pipeline_mode<synchronous>, transform_indices = @transform_1, window_bounds = array<i64: 10, 22>}, {pipeline_mode = #tpu.pipeline_mode<synchronous>, transform_indices = @transform_2, window_bounds = array<i64: 10, 1>}, {pipeline_mode = #tpu.pipeline_mode<synchronous>, transform_indices = @transform_3, window_bounds = array<i64: 10, 1>}, {pipeline_mode = #tpu.pipeline_mode<synchronous>, transform_indices = @transform_4, window_bounds = array<i64: 1, 1>}, {transform_indices = @transform_5, window_bounds = array<i64: 1, 512>}]} {
    %c0 = arith.constant 0 : index
    %c0_0 = arith.constant 0 : index
    %0 = vector.load %arg1[%c0, %c0_0] : memref<22x512xf32, #tpu.memory_space<vmem>>, vector<22x512xf32>
    %c0_1 = arith.constant 0 : index
    %c0_2 = arith.constant 0 : index
    %1 = vector.load %arg2[%c0_1, %c0_2] : memref<10x22xf32, #tpu.memory_space<vmem>>, vector<10x22xf32>
    %cst = arith.constant dense<0.000000e+00> : vector<10x512xf32>
    %2 = tpu.matmul %1, %0, %cst {dimension_numbers = #tpu.dot_dimension_numbers<[1], [0], [0], [1], [0, 0, 1, 1], [], []>} : vector<10x22xf32>, vector<22x512xf32>, vector<10x512xf32> -> vector<10x512xf32>
    %c0_3 = arith.constant 0 : index
    %c0_4 = arith.constant 0 : index
    %3 = vector.load %arg3[%c0_3, %c0_4] : memref<10x1xf32, #tpu.memory_space<vmem>>, vector<10x1xf32>
    %4 = vector.broadcast %3 : vector<10x1xf32> to vector<10x512xf32>
    %5 = arith.addf %2, %4 : vector<10x512xf32>
    %cst_5 = arith.constant 0.000000e+00 : f32
    %6 = vector.broadcast %cst_5 : f32 to vector<10x512xf32>
    %7 = arith.maximumf %5, %6 : vector<10x512xf32>
    %c0_6 = arith.constant 0 : index
    %c0_7 = arith.constant 0 : index
    %8 = vector.load %arg4[%c0_6, %c0_7] : memref<10x1xf32, #tpu.memory_space<vmem>>, vector<10x1xf32>
    %9 = vector.broadcast %8 : vector<10x1xf32> to vector<10x512xf32>
    %10 = arith.mulf %7, %9 : vector<10x512xf32>
    %cst_8 = arith.constant dense<0.000000e+00> : vector<512xf32>
    %11 = vector.multi_reduction <add>, %10, %cst_8 [0] : vector<10x512xf32> to vector<512xf32>
    %12 = vector.shape_cast %11 : vector<512xf32> to vector<1x512xf32>
    %c0_9 = arith.constant 0 : index
    %c0_10 = arith.constant 0 : index
    %13 = vector.load %arg5[%c0_9, %c0_10] : memref<1x1xf32, #tpu.memory_space<vmem>>, vector<1x1xf32>
    %14 = vector.broadcast %13 : vector<1x1xf32> to vector<1x512xf32>
    %15 = arith.addf %12, %14 : vector<1x512xf32>
    %c0_11 = arith.constant 0 : index
    %c0_12 = arith.constant 0 : index
    %16 = vector.load %arg6[%c0_11, %c0_12] : memref<1x512xf32, #tpu.memory_space<vmem>>, vector<1x512xf32>
    tpu.vector_store %arg6[%c0_11, %c0_12], %15 {strides = array<i32>} : memref<1x512xf32, #tpu.memory_space<vmem>>, vector<1x512xf32>,
    return
  }
  func.func @transform_0(%arg0: i32) -> (i32, i32) {
    %c0_i32 = arith.constant 0 : i32
    %c0_i32_0 = arith.constant 0 : i32
    return %c0_i32, %arg0 : i32, i32
  }
  func.func @transform_1(%arg0: i32) -> (i32, i32) {
    %c0_i32 = arith.constant 0 : i32
    %c0_i32_0 = arith.constant 0 : i32
    %c0_i32_1 = arith.constant 0 : i32
    return %c0_i32, %c0_i32_0 : i32, i32
  }
  func.func @transform_2(%arg0: i32) -> (i32, i32) {
    %c0_i32 = arith.constant 0 : i32
    %c0_i32_0 = arith.constant 0 : i32
    %c0_i32_1 = arith.constant 0 : i32
    return %c0_i32, %c0_i32_0 : i32, i32
  }
  func.func @transform_3(%arg0: i32) -> (i32, i32) {
    %c0_i32 = arith.constant 0 : i32
    %c0_i32_0 = arith.constant 0 : i32
    %c0_i32_1 = arith.constant 0 : i32
    return %c0_i32, %c0_i32_0 : i32, i32
  }
  func.func @transform_4(%arg0: i32) -> (i32, i32) {
    %c0_i32 = arith.constant 0 : i32
    %c0_i32_0 = arith.constant 0 : i32
    %c0_i32_1 = arith.constant 0 : i32
    return %c0_i32, %c0_i32_0 : i32, i32
  }
  func.func @transform_5(%arg0: i32) -> (i32, i32) {
    %c0_i32 = arith.constant 0 : i32
    %c0_i32_0 = arith.constant 0 : i32
    return %c0_i32, %arg0 : i32, i32
  }
}

</mosaic_0001>

<bundles_post_ra>
// kernel: tpu_custom_call.1
= control target key start
LH: loop header
LB: loop body
LE: loop exit
PB: predicated region body
PF: predicated region fallthrough
CT: control target
= control target key end

     0   :  { %s1065_s0 = inlined_call_operand.hbm [shape: f32[22,2048], index: 0, kind: input, shape index: {}]   ;;  %s1066_s1 = inlined_call_operand.vmem [shape: f32[10,22], index: 1, kind: input, shape index: {}]   ;;  %s1067_s2 = inlined_call_operand.vmem [shape: f32[10,1], index: 2, kind: input, shape index: {}]   ;;  %s1068_s3 = inlined_call_operand.vmem [shape: f32[10,1], index: 3, kind: input, shape index: {}]   ;;  %s1069_s4 = inlined_call_operand.<no memory space> [shape: f32[1,1], index: 4, kind: input, shape index: {}]   ;;  %s1070_s5 = inlined_call_operand.hbm [shape: f32[1,2048], index: 5, kind: output, shape index: {}]  }
   0x1   :  { %v10_v0 = vstv %s1069_s4 }
   0x2   :  { %11 = vst [vmem:[#allocation2] sm:$0x1] %v10_v0 }
   0x3   :  { %12 = vsyncpa [#allocation4], 0 }
   0x4   :  { %14 = vsyncpa [#allocation4 + $0x1], 0 }
   0x5   :  { %15 = vsyncpa [#allocation5], 0 }
   0x6   :  { %17 = vsyncpa [#allocation5 + $0x1], 0  ;;  %s866_s20 = smov 0   ;;  %s868_s21 = smov 0  }
   0x7   :  { %s870_s22 = smov 0   ;;  %s872_s23 = smov 0  }
   0x8 LB: > { %s887_s4 = sadd.s32 4294967295, %s823_s23   ;;  %s641_s24 = sadd.s32 4294967294, %s823_s23   ;;  %s823_s23 = sphi %s872_s23, %s1082_s23   ;;  %s819_s22 = sphi %s870_s22, %s1081_s22   ;;  %s815_s21 = sphi %s868_s21, %s1080_s21   ;;  %s811_s20 = sphi %s866_s20, %s1079_s20  }
   0x9   : > { %s891_s25 = sadd.s32 1, %s823_s23   ;;  %s30_s26 = sadd.s32 1, %s819_s22 }
   0xa   : > { %s27_s27 = ssub.s32 %s823_s23, %s891_s25  ;;  %p37_p0 = scmp.ne.s32.totalorder %s819_s22, %s815_s21 }
   0xb   : > { %p28_p1 = scmp.eq.s32.totalorder %s27_s27, 0  ;;  %p38_p2 = scmp.eq.s32.totalorder %s823_s23, 0 }
   0xc   : > { %p43_p3 = scmp.ne.s32.totalorder %s815_s21, %s811_s20  ;;  %p44_p4 = scmp.eq.s32.totalorder %s887_s4, 0 }
   0xd   : > { %s903_s28 = scalar_select %p28_p1, %s819_s22, %s30_s26  }
   0xe   : > { %p39_p5 = por %p38_p2, %p37_p0  ;;  %p905_p6 = por %p44_p4, %p43_p3 }
   0xf   : > { %p151_p7 = scmp.eq.s32.totalorder %s887_s4, 3  ;;  %p157_p8 = scmp.eq.s32.totalorder %s641_s24, 3 }
  0x10   : > { %p685_p9 = scmp.lt.s32.totalorder %s823_s23, 4  ;;  %s189_s7 = sand.u32 1, %s819_s22  }
  0x11   : > { %p911_p10 = por %p151_p7, %p37_p0  ;;  %p915_p11 = por %p157_p8, %p43_p3 }
  0x12   : > { %s661_s8 = sshll.u32 %s823_s23, 9  ;;  %s671_s9 = smul.u32 96, %s189_s7 }
  0x13   : > { %s1073_s30 = scalar_select %p911_p10, 1, 0 }
  0x14   : > { %s1074_s6 = scalar_select %p915_p11, 1, 0 }
  0x15   : > { %s924_s12 = scalar_lea.hbm %s1065_s0, %s661_s8  ;;  %p926_p12 = pnand %p685_p9, %p39_p5 }
  0x16   : > { %s193_s14 = scalar_lea.vmem [#allocation3], %s671_s9  ;;  %s933_s16 = scalar_lea.sflag [#allocation4], %s189_s7 }
  0x17   : > { %s200_s15 = sshll.u32 %s193_s14, 4  ;;  %s727_s17 = scalar_lea.hbm %s924_s12, 1536  ;;  %s930_s15 = int_to_ptr.vmem [resolvable:$true] %s200_s15 }
  0x18   : > { %p728_p0 = scmp.ne.s32.totalorder %s924_s12, %s727_s17  ;;  %p729_p1 = pneg %p926_p12 }
  0x19   : > { %s732_s24 = scalar_lea.hbm %s1065_s0, 6144  ;;  %p733_p4 = scmp.lt.u32.totalorder %s924_s12, %s1065_s0 }
  0x1a   : > { %p730_p2 = pnand %p729_p1, %p728_p0  ;;  %p734_p5 = scmp.lt.u32.totalorder %s732_s24, %s727_s17 }
  0x1b   : > { %p736_p8 = scmp.lt.u32.totalorder %s727_s17, %s924_s12 }
  0x1c   : > { %p731_p3 = pneg %p730_p2  ;;  %p735_p7 = por %p734_p5, %p733_p4 }
  0x1e   : > { %p737_p9 = por %p736_p8, %p735_p7 }
  0x20   : > { %p738_p13 = pnand %p737_p9, %p731_p3 }
  0x22   : > { %741 = shalt.err (!%p738_p13)
}
  0x23   : > { %s742_s7 = scalar_lea.vmem %s930_s15, 1536  ;;  %s825_s8 = smov [#allocation3]  }
  0x24   : > { %p743_p0 = scmp.ne.s32.totalorder %s930_s15, %s742_s7  ;;  %s747_s9 = sshll.u32 %s825_s8, 4  ;;  %s748_s9 = int_to_ptr.vmem [resolvable:$false] %s747_s9 }
  0x25   : > { %s749_s10 = scalar_lea.vmem %s748_s9, 3072  ;;  %p750_p10 = scmp.lt.s32.totalorder %s930_s15, %s748_s9 }
  0x26   : > { %p745_p2 = pnand %p743_p0, %p729_p1  ;;  %p751_p4 = scmp.lt.s32.totalorder %s749_s10, %s742_s7 }
  0x28   : > { %p746_p11 = pneg %p745_p2  ;;  %p752_p5 = por %p751_p4, %p750_p10 }
  0x2a   : > { %p753_p7 = pnand %p752_p5, %p746_p11 }
  0x2c   : > { %756 = shalt.err (!%p753_p7)
}
  0x2d   : > { %s826_s11 = smov 2048   ;;  %s827_s14 = smov 512  }
  0x2e   : > { %s828_s17 = smov 32   ;;  %p208_p13 = scmp.lt.s32.totalorder %s823_s23, 5 }
  0x2f   : > { %680 = dma.hbm_to_vmem [thread:$0]  (!%p926_p12), %s924_s12, 1536, %s930_s15, %s933_s16, %s826_s11, %s827_s14, %s828_s17  }
  0x30   : > { %p1076_p1 = scmp.ge.s32.totalorder %s823_s23, 1 }
  0x32   : > { %p209_p3 = pnand %p1076_p1, %p208_p13 }
  0x33   : > { %s965_s18 = sand.u32 (!%p209_p3), 1, %s815_s21  }
  0x34   : > { %212 = sbr.rel (%p209_p3) target bundleno = 333 (0x14d), region = 40  ;;  %s215_s24 = scalar_lea.sflag (!%p209_p3), [#allocation4], %s965_s18 }
  0x35   : > { %s672_s19 = smul.u32 (!%p209_p3), 96, %s965_s18 }
  0x37   : > { %s969_s26 = scalar_lea.vmem (!%p209_p3), [#allocation3], %s672_s19 }
  0x3b   : > { %802 = dma.done.wait (%p905_p6), %s215_s24, 1536  }
  0x3c   : > { %804 = vsyncadd (%p905_p6), %s215_s24, 4294965760  ;;  %v829_v1 = vmov 0.0   ;;  %v830_v2 = vmov 0   ;;  %v248_v3 = vld [vmem:[%s969_s26 + $0x8] sm:$0xff]  ;;  %v250_v5 = vld [vmem:[%s969_s26 + $0x18] sm:$0xff]  ;;  %vm280_vm0 = vcmask 1045504   ;;  %v514_v55 = vlaneseq }
  0x3d   : > { %357 = vmatprep.mubr.f32.mxu0 %v829_v1  ;;  %434 = vmatprep.mubr.f32.mxu1 %v829_v1  ;;  %v252_v4 = vld [vmem:[%s969_s26 + $0x28] sm:$0xff]  ;;  %v254_v7 = vld [vmem:[%s969_s26 + $0x38] sm:$0xff]  ;;  %v247_v8 = vld [vmem:[%s969_s26] sm:$0xff]  ;;  %vm273_vm1 = vcmask 179200   ;;  %vm475_vm2 = vcmask 1041408   ;;  %s647_s17 = sshll.u32 %s965_s18, 2 }
  0x3e   : > { %725 = vset.pattern.permute.xlu0 %v830_v2  ;;  %726 = vset.pattern.permute.xlu1 %v830_v2  ;;  %v663_v6 = vpack.c.bf16 %v252_v4, %v248_v3  ;;  %v251_v9 = vld [vmem:[%s969_s26 + $0x20] sm:$0xff]  ;;  %v667_v10 = vpack.c.bf16 %v254_v7, %v250_v5  ;;  %v249_v12 = vld [vmem:[%s969_s26 + $0x10] sm:$0xff]  ;;  %v256_v14 = vld [vmem:[%s969_s26 + $0x48] sm:$0x3f]  ;;  %s662_s19 = sshll.u32 %s887_s4, 6  ;;  %s244_s24 = scalar_lea.vmem [#allocation6], %s647_s17 }
  0x3f   : > { %v665_v11 = vpack.c.bf16 %v251_v9, %v247_v8  ;;  %v253_v13 = vld [vmem:[%s969_s26 + $0x30] sm:$0xff]  ;;  %v258_v16 = vld [vmem:[%s969_s26 + $0x58] sm:$0x3f]  ;;  %v262_v17 = vld [vmem:[%s1067_s2 + $0x8] sm:$0x3]  ;;  %vm553_vm3 = vcmp.lt.s32.totalorder %v514_v55, 512  ;;  %s1022_s13 = scalar_lea.hbm %s1070_s5, %s662_s19 }
  0x40   : > { %664 = vmatprep.subr.bf16.mxu0 %v663_v6  ;;  %v669_v15 = vpack.c.bf16 %v253_v13, %v249_v12  ;;  %668 = vmatprep.subr.bf16.mxu1 %v667_v10  ;;  %v255_v18 = vld [vmem:[%s969_s26 + $0x40] sm:$0x3f]  ;;  %v456_v19 = vld [vmem:[%s1068_s3 + $0x8] sm:$0x3]  ;;  %v257_v20 = vld [vmem:[%s969_s26 + $0x50] sm:$0x3f] }
  0x41   : > { %666 = vmatpush1.bf16.msra.mxu0 %v665_v11  ;;  %v259_v21 = vld [vmem:[%s1066_s1] sm:$0xff]  ;;  %270 = vperm.xlu0 %725, %v262_v17   ;;  %v260_v24 = vld [vmem:[%s1066_s1 + $0x8] sm:$0x3]  ;;  %v515_v10 = vshrl.u32 %v514_v55, 7  ;;  %v831_v17 = vmov 1966171168  }
  0x42   : > { %670 = vmatpush1.bf16.msra.mxu1 %v669_v15  ;;  %648 = vmatprep.subr.msk.mxu0 %vm280_vm0, %v256_v14  ;;  %v261_v22 = vld [vmem:[%s1067_s2] sm:$0xff]  ;;  %s571_s26 = sshll.u32 %s244_s24, 4  ;;  %s557_s15 = scalar_lea.sflag [#allocation5], %s965_s18  ;;  %s1024_s26 = int_to_ptr.vmem [resolvable:$true] %s571_s26 }
  0x43   : > { %652 = vmatprep.subr.msk.mxu1 %vm280_vm0, %v258_v16  ;;  %464 = vperm.xlu1 %726, %v456_v19   ;;  %v455_v23 = vld [vmem:[%s1068_s3] sm:$0xff]  ;;  %s757_s16 = scalar_lea.vmem %s1024_s26, 64  ;;  %p1077_p10 = scmp.ne.s32.totalorder %s1073_s30, 0 }
  0x44   : > { %v508_v25 = vld [vmem:[#allocation2] sm:$0x1]  ;;  %p758_p6 = scmp.ne.s32.totalorder %s1024_s26, %s757_s16  ;;  %s832_s4 = smov [#allocation6]  }
  0x45   : > { %649 = vmatpush1.msk.msra.mxu0 %vm280_vm0, %v255_v18  ;;  %265 = vperm.xlu0 %725, %v261_v22   ;;  %v529_v18 = vunpack.c.l.s4 %v831_v17  ;;  %s761_s27 = sshll.u32 %s832_s4, 4  ;;  %s762_s27 = int_to_ptr.vmem [resolvable:$false] %s761_s27 }
  0x46   : > { %653 = vmatpush1.msk.msra.mxu1 %vm280_vm0, %v257_v20  ;;  %650 = vmatmul.mubr.msk.f32.vlgmr.msra.gmra.mrb[0].mxu0 %vm273_vm1, %v259_v21  ;;  %p759_p11 = pnand %p758_p6, %p1077_p10  ;;  %s763_s7 = scalar_lea.vmem %s762_s27, 128 }
  0x47   : > { %654 = vmatmul.mubr.msk.f32.vlgmr.msra.gmra.mrb[0].mxu1 %vm273_vm1, %v259_v21  ;;  %363 = vmatprep.mubr.f32.mxu0 %v829_v1  ;;  %v516_v21 = vsub.s32 0, %v515_v10  ;;  %p764_p8 = scmp.lt.s32.totalorder %s1024_s26, %s762_s27  ;;  %p765_p9 = scmp.lt.s32.totalorder %s763_s7, %s757_s16 }
  0x48   : > { %440 = vmatprep.mubr.f32.mxu1 %v829_v1  ;;  %459 = vperm.xlu1 %726, %v455_v23   ;;  %p760_p12 = pneg %p759_p11 }
  0x49   : > { %511 = vperm.xlu0 %725, %v508_v25   ;;  %p766_p0 = por %p765_p9, %p764_p8 }
  0x4a   : > { %651 = vmatmul.mubr.msk.f32.gmra.mrb[2].mxu0 %vm273_vm1, %v260_v24 }
  0x4b   : > { %655 = vmatmul.mubr.msk.f32.gmra.mrb[2].mxu1 %vm273_vm1, %v260_v24  ;;  %p767_p2 = pnand %p766_p0, %p760_p12 }
  0xc0   : > { %v271_v26 = vpop.permute.xlu0 %270 }
  0xc2   : > { %v465_v27 = vpop.permute.xlu1 %464 }
  0xc4   : > { %v266_v28 = vpop.permute.xlu0 %265 }
  0xc7   : > { %v460_v47 = vpop.permute.xlu1 %459 }
  0xc8   : > { %v512_v24 = vpop.permute.xlu0 %511 }
 0x119   : > { %v359_v29 = vpop.f32.mrb[0].mxu0 }
 0x11a   : > { %v436_v30 = vpop.f32.mrb[0].mxu1  ;;  %v361_v31 = vpop.f32.mrb[1].mxu0  ;;  %v360_v32 = vadd.f32 %v359_v29, %v266_v28  ;;  %v530_v29 = vunpack.c.0.s8 %v529_v18 }
 0x11b   : > { %v438_v33 = vpop.f32.mrb[1].mxu1  ;;  %v437_v34 = vadd.f32 %v436_v30, %v266_v28  ;;  %v362_v35 = vadd.f32 %v361_v31, %v266_v28 }
 0x11c   : > { %v439_v36 = vadd.f32 %v438_v33, %v266_v28  ;;  %v447_v41 = vmax.f32 %v360_v32, 0.0  ;;  %v517_v32 = vrot.slane %v512_v24, %v516_v21 }
 0x11d   : > { %v365_v37 = vpop.f32.mrb[2].mxu0  ;;  %v449_v45 = vmax.f32 %v437_v34, 0.0  ;;  %v448_v46 = vmax.f32 %v362_v35, 0.0 }
 0x11e   : > { %v366_v38 = vadd.f32 %v365_v37, %v271_v26  ;;  %v442_v39 = vpop.f32.mrb[2].mxu1  ;;  %v367_v40 = vpop.f32.mrb[3].mxu0  ;;  %v450_v50 = vmax.f32 %v439_v36, 0.0  ;;  %v467_v56 = vmul.f32 %v460_v47, %v447_v41 }
 0x11f   : > { %v443_v42 = vadd.f32 %v442_v39, %v271_v26  ;;  %v368_v43 = vadd.f32 %v367_v40, %v271_v26  ;;  %v444_v44 = vpop.f32.mrb[3].mxu1  ;;  %v468_v59 = vmul.f32 %v460_v47, %v448_v46  ;;  %v469_v60 = vmul.f32 %v460_v47, %v449_v45 }
 0x120   : > { %v451_v48 = vmax.f32 %v366_v38, 0.0  ;;  %v445_v49 = vadd.f32 %v444_v44, %v271_v26  ;;  %v470_v63 = vmul.f32 %v460_v47, %v450_v50  ;;  %v533_v39 = vsub.s32 %v530_v29, %v515_v10 }
 0x121   : > { %v453_v51 = vmax.f32 %v443_v42, 0.0  ;;  %v452_v52 = vmax.f32 %v368_v43, 0.0 }
 0x122   : > { %v471_v53 = vmul.f32 %v465_v27, %v451_v48  ;;  %v454_v54 = vmax.f32 %v445_v49, 0.0 }
 0x123   : > { %v473_v57 = vmul.f32 %v465_v27, %v453_v51  ;;  %v472_v58 = vmul.f32 %v465_v27, %v452_v52 }
 0x124   : > { %v476_v61 = vsel %vm475_vm2, %v471_v53, 0.0  ;;  %v474_v62 = vmul.f32 %v465_v27, %v454_v54 }
 0x125   : > { %v477_v0 = vadd.f32 %v476_v61, %v467_v56  ;;  %v492_v1 = vsel %vm475_vm2, %v473_v57, 0.0  ;;  %v484_v2 = vsel %vm475_vm2, %v472_v58, 0.0 }
 0x126   : > { %v493_v3 = vadd.f32 %v492_v1, %v469_v60  ;;  %v485_v4 = vadd.f32 %v484_v2, %v468_v59  ;;  %v500_v5 = vsel %vm475_vm2, %v474_v62, 0.0 }
 0x127   : > { %v478_v6 = vrot.slane %v477_v0, 4  ;;  %v501_v7 = vadd.f32 %v500_v5, %v470_v63 }
 0x128   : > { %v494_v8 = vrot.slane %v493_v3, 4  ;;  %v486_v9 = vrot.slane %v485_v4, 4 }
 0x129   : > { %v479_v11 = vadd.f32 %v478_v6, %v477_v0  ;;  %v502_v12 = vrot.slane %v501_v7, 4 }
 0x12a   : > { %v495_v13 = vadd.f32 %v494_v8, %v493_v3  ;;  %v487_v14 = vadd.f32 %v486_v9, %v485_v4 }
 0x12b   : > { %v480_v15 = vrot.slane %v479_v11, 2  ;;  %v503_v16 = vadd.f32 %v502_v12, %v501_v7 }
 0x12c   : > { %v496_v19 = vrot.slane %v495_v13, 2  ;;  %v488_v20 = vrot.slane %v487_v14, 2 }
 0x12d   : > { %v481_v22 = vadd.f32 %v480_v15, %v479_v11  ;;  %v504_v23 = vrot.slane %v503_v16, 2 }
 0x12e   : > { %v497_v25 = vadd.f32 %v496_v19, %v495_v13  ;;  %v489_v26 = vadd.f32 %v488_v20, %v487_v14 }
 0x12f   : > { %v482_v27 = vrot.slane %v481_v22, 1  ;;  %v505_v28 = vadd.f32 %v504_v23, %v503_v16 }
 0x130   : > { %v498_v30 = vrot.slane %v497_v25, 1  ;;  %v490_v31 = vrot.slane %v489_v26, 1 }
 0x131   : > { %v483_v33 = vadd.f32 %v482_v27, %v481_v22  ;;  %v506_v34 = vrot.slane %v505_v28, 1 }
 0x132   : > { %v499_v35 = vadd.f32 %v498_v30, %v497_v25  ;;  %v491_v36 = vadd.f32 %v490_v31, %v489_v26 }
 0x133   : > { %v518_v37 = vadd.f32 %v517_v32, %v483_v33  ;;  %v507_v38 = vadd.f32 %v506_v34, %v505_v28 }
 0x134   : > { %v520_v40 = vadd.f32 %v517_v32, %v499_v35  ;;  %v519_v41 = vadd.f32 %v517_v32, %v491_v36 }
 0x135   : > { %v521_v42 = vadd.f32 %v517_v32, %v507_v38 }
 0x136   : > { %v526_v43 = vcombine.low %v518_v37, %v519_v41 }
 0x137   : > { %v527_v44 = vcombine.low %v520_v40, %v521_v42 }
 0x138   : > { %v534_v45 = vrot.slane %v526_v43, %v533_v39 }
 0x139   : > { %v541_v46 = vrot.slane %v527_v44, %v533_v39 }
 0x13b   : > { %v542_v47 = vcombine.low %v534_v45, %v541_v46 }
 0x13d   : > { %v549_v48 = vrot.slane %v542_v47, %v533_v39 }
 0x13f   : > { %555 = vst.msk [vmem:[%s244_s24] sm:$0xf] %vm553_vm3, %v549_v48 }
 0x140   : > { %770 = shalt.err (!%p767_p2)
}
 0x141   : > { %s771_s18 = scalar_lea.hbm %s1022_s13, 64  ;;  %s775_s10 = scalar_lea.hbm %s1070_s5, 256 }
 0x142   : > { %p772_p4 = scmp.ne.s32.totalorder %s1022_s13, %s771_s18  ;;  %p776_p13 = scmp.lt.u32.totalorder %s1022_s13, %s1070_s5 }
 0x143   : > { %p777_p1 = scmp.lt.u32.totalorder %s775_s10, %s771_s18  ;;  %p779_p6 = scmp.lt.u32.totalorder %s771_s18, %s1022_s13 }
 0x144   : > { %p773_p5 = pnand %p772_p4, %p1077_p10 }
 0x145   : > { %p778_p3 = por %p777_p1, %p776_p13 }
 0x146   : > { %p774_p7 = pneg %p773_p5 }
 0x147   : > { %p780_p11 = por %p779_p6, %p778_p3 }
 0x149   : > { %p781_p12 = pnand %p780_p11, %p774_p7 }
 0x14b   : > { %784 = shalt.err (!%p781_p12)
}
 0x14c   : > { %675 = dma.vmem_to_hbm [thread:$0]  (%p1077_p10), %s1024_s26, 64, %s1022_s13, %s557_s15  }
 0x14d PF: > { %p686_p8 = scmp.ge.s32.totalorder %s823_s23, 2  ;;  %s583_s17 = sand.u32 1, %s811_s20  }
 0x14e   : > { %p1078_p9 = scmp.ne.s32.totalorder %s1074_s6, 0  ;;  %s584_s19 = scalar_lea.sflag [#allocation5], %s583_s17 }
 0x150   : > { %p682_p0 = pnand %p686_p8, %p1078_p9 }
 0x152   : > { %806 = dma.done.wait (!%p682_p0), %s584_s19, 64  }
 0x153   : > { %808 = vsyncadd (!%p682_p0), %s584_s19, 4294967232  ;;  %p20_p2 = scmp.ge.s32.totalorder %s891_s25, 6   ;;  %s1079_s20 = smov %s815_s21 }
 0x154   : > { %s1080_s21 = smov %s819_s22  ;;  %s1081_s22 = smov %s903_s28 }
 0x155   : > { %s1082_s23 = smov %s891_s25  ;;  %22 = sbr.rel (!%p20_p2) target bundleno = 8 (0x8), region = 85 }
 0x15c   :  { %589 = vsyncpa [#allocation4], 1 }
 0x15d   :  { %591 = vsyncpa [#allocation4 + $0x1], 1 }
 0x15e   :  { %592 = vsyncpa [#allocation5], 1 }
 0x15f   :  { %594 = vsyncpa [#allocation5 + $0x1], 1 }

</bundles_post_ra>
